<compile_context>
chip_gen: v5e
topology: v5e:2x2
jax: 0.10.0
libtpu: 0.0.40
codegen_flags: <defaults>
</compile_context>

<pallas_src>
import jax
import jax.numpy as jnp
from jax.experimental import pallas as pl
from jax.experimental.pallas import tpu as pltpu


def discriminator_kernel(x_ref, w1_ref, b1_ref, w2_ref, b2_ref, o_ref):
    # Hidden layer on the MXU: cast the f32 x tile to bf16 in VMEM (saves a
    # separate host-side HBM cast pass), accumulate in f32.
    x_bf = x_ref[...].astype(jnp.bfloat16)
    z = jnp.dot(x_bf, w1_ref[...], preferred_element_type=jnp.float32) + b1_ref[...]
    # Sigmoid via EUP exp + approximate reciprocal (keeps the (tm, 256)
    # activation epilogue off the VALU).  Padded hidden columns give h = 0.5,
    # but their w2 entries are zero so they contribute nothing below.
    h = pl.reciprocal(1.0 + jnp.exp(-z), approx=True)              # (tm, hid_pad) f32
    # Output layer (hid_pad -> 1), computed directly as a lane-dense row:
    # (1, hid_pad) @ (hid_pad, tm) -> (1, tm) on the MXU.
    y = jnp.dot(w2_ref[...], h.T, preferred_element_type=jnp.float32)  # (1, tm)
    sig = jax.nn.sigmoid(y + b2_ref[...])                          # (1, tm) f32
    o_ref[...] = sig.reshape(o_ref.shape)                          # (1, 1, tm)


def _round_up(v, m):
    return ((v + m - 1) // m) * m


def discriminator_forward(x, w1, b1, w2, b2, *, block_m=1024):
    """x: (B, 784) f32; w1: (784, 200); b1: (200,); w2: (200, 1); b2: (1,).

    Returns (B, 1) f32, matching nn.Sequential(Linear, Sigmoid, Linear, Sigmoid).
    """
    x = x.astype(jnp.float32)
    B, in_dim = x.shape
    hid = w1.shape[1]

    # ---- lane-align the hidden dimension (200 -> 256) -----------------------
    hid_pad = max(128, pl.cdiv(hid, 128) * 128)
    w1p = jnp.zeros((in_dim, hid_pad), jnp.bfloat16).at[:, :hid].set(
        w1.astype(jnp.bfloat16))
    b1p = jnp.zeros((1, hid_pad), jnp.float32).at[:, :hid].set(
        b1.astype(jnp.float32))
    w2p = jnp.zeros((1, hid_pad), jnp.float32).at[:, :hid].set(
        w2[:, 0].astype(jnp.float32))
    b2p = b2.reshape(1, 1).astype(jnp.float32)

    # ---- batch tiling --------------------------------------------------------
    # Multiple of 16 (bf16 sublane packing); primary tuning knob is block_m.
    tm = min(_round_up(max(block_m, 16), 16), _round_up(B, 16))
    # v7x: grid axes marked "parallel" are sharded across both TensorCores --
    # keep >= 2 grid steps for medium/large batches.
    if B >= 512 and pl.cdiv(B, tm) < 2:
        tm = _round_up(pl.cdiv(B, 2), 16)
    grid_n = pl.cdiv(B, tm)

    # Only pad when the whole batch is smaller than one tile (tiny copy);
    # otherwise rely on Pallas partial-last-block handling.
    if B < tm:
        x = jnp.zeros((tm, in_dim), jnp.float32).at[:B].set(x)

    out = pl.pallas_call(
        discriminator_kernel,
        out_shape=jax.ShapeDtypeStruct((grid_n, 1, tm), jnp.float32),
        grid_spec=pltpu.PrefetchScalarGridSpec(
            num_scalar_prefetch=0,
            grid=(grid_n,),
            in_specs=[
                pl.BlockSpec((tm, in_dim), lambda i: (i, 0)),       # x tile (f32)
                pl.BlockSpec((in_dim, hid_pad), lambda i: (0, 0)),  # w1 (resident, bf16)
                pl.BlockSpec((1, hid_pad), lambda i: (0, 0)),       # b1 (resident)
                pl.BlockSpec((1, hid_pad), lambda i: (0, 0)),       # w2 row (resident)
                pl.BlockSpec((1, 1), lambda i: (0, 0)),             # b2 (resident)
            ],
            out_specs=pl.BlockSpec((1, 1, tm), lambda i: (i, 0, 0)),  # lane-dense row
        ),
        compiler_params=pltpu.CompilerParams(
            dimension_semantics=("parallel",),
            vmem_limit_bytes=32 * 1024 * 1024,
        ),
    )(x, w1p, b1p, w2p, b2p)

    return out.reshape(grid_n * tm, 1)[:B]


def init_params(key):
    """PyTorch-Linear-style init: U(-1/sqrt(fan_in), 1/sqrt(fan_in))."""
    k1, k2, k3, k4 = jax.random.split(key, 4)
    in_dim, hid, out_dim = 28 * 28, 200, 1
    s1 = 1.0 / jnp.sqrt(in_dim)
    s2 = 1.0 / jnp.sqrt(hid)
    w1 = jax.random.uniform(k1, (in_dim, hid), jnp.float32, -s1, s1)
    b1 = jax.random.uniform(k2, (hid,), jnp.float32, -s1, s1)
    w2 = jax.random.uniform(k3, (hid, out_dim), jnp.float32, -s2, s2)
    b2 = jax.random.uniform(k4, (out_dim,), jnp.float32, -s2, s2)
    return w1, b1, w2, b2


def reference_forward(x, w1, b1, w2, b2):
    h = jax.nn.sigmoid(x @ w1 + b1[None, :])
    return jax.nn.sigmoid(h @ w2 + b2[None, :])


if __name__ == "__main__":
    key = jax.random.PRNGKey(0)
    kp, kx = jax.random.split(key)
    w1, b1, w2, b2 = init_params(kp)

    B = 20  # small batch of flattened 28x28 "images" (not a multiple of 16)
    x = jax.random.uniform(kx, (B, 28 * 28), jnp.float32)

    # block_m=16: exercises multiple grid tiles + a partial last block.
    out_small = discriminator_forward(x, w1, b1, w2, b2, block_m=16)
    out_small = jax.block_until_ready(out_small)
    assert out_small.shape == (B, 1)

    # Default block_m: single (padded) tile path.
    out_default = discriminator_forward(x, w1, b1, w2, b2)
    out_default = jax.block_until_ready(out_default)
    assert out_default.shape == (B, 1)

    # Reference with the same bf16-rounded x/w1 (kernel accumulates in f32).
    ref_bf = reference_forward(
        x.astype(jnp.bfloat16).astype(jnp.float32),
        w1.astype(jnp.bfloat16).astype(jnp.float32),
        b1, w2, b2,
    )
    ref_f32 = reference_forward(x, w1, b1, w2, b2)

    for out in (out_small, out_default):
        assert jnp.allclose(out, ref_bf, atol=2e-3, rtol=2e-3)
        assert jnp.allclose(out, ref_f32, atol=5e-2)
    # Both tilings must agree on the valid rows.
    assert jnp.allclose(out_small, out_default, atol=1e-5)

    print("KERNEL_OK")
</pallas_src>

<mosaic_0001>
module attributes {stable_mosaic.version = 11 : i64} {
  func.func @discriminator_kernel(%arg0: i32, %arg1: memref<16x784xf32, #tpu.memory_space<vmem>>, %arg2: memref<784x256xbf16, #tpu.memory_space<vmem>>, %arg3: memref<1x256xf32, #tpu.memory_space<vmem>>, %arg4: memref<1x256xf32, #tpu.memory_space<vmem>>, %arg5: memref<1x1xf32, #tpu.memory_space<vmem>>, %arg6: memref<1x1x16xf32, #tpu.memory_space<vmem>>) attributes {dimension_semantics = [#tpu.dimension_semantics<parallel>], iteration_bounds = array<i64: 2>, scalar_prefetch = 0 : i64, scratch_operands = 0 : i64, tpu.core_type = #tpu.core_type<tc>, window_params = [{transform_indices = @transform_0, window_bounds = array<i64: 16, 784>}, {pipeline_mode = #tpu.pipeline_mode<synchronous>, transform_indices = @transform_1, window_bounds = array<i64: 784, 256>}, {pipeline_mode = #tpu.pipeline_mode<synchronous>, transform_indices = @transform_2, window_bounds = array<i64: 1, 256>}, {pipeline_mode = #tpu.pipeline_mode<synchronous>, transform_indices = @transform_3, window_bounds = array<i64: 1, 256>}, {pipeline_mode = #tpu.pipeline_mode<synchronous>, transform_indices = @transform_4, window_bounds = array<i64: 1, 1>}, {transform_indices = @transform_5, window_bounds = array<i64: 1, 1, 16>}]} {
    %c0 = arith.constant 0 : index
    %c0_0 = arith.constant 0 : index
    %0 = vector.load %arg1[%c0, %c0_0] : memref<16x784xf32, #tpu.memory_space<vmem>>, vector<16x784xf32>
    %1 = arith.truncf %0 : vector<16x784xf32> to vector<16x784xbf16>
    %c0_1 = arith.constant 0 : index
    %c0_2 = arith.constant 0 : index
    %2 = vector.load %arg2[%c0_1, %c0_2] : memref<784x256xbf16, #tpu.memory_space<vmem>>, vector<784x256xbf16>
    %cst = arith.constant dense<0.000000e+00> : vector<16x256xf32>
    %3 = tpu.matmul %1, %2, %cst {dimension_numbers = #tpu.dot_dimension_numbers<[1], [0], [0], [1], [0, 0, 1, 1], [], []>} : vector<16x784xbf16>, vector<784x256xbf16>, vector<16x256xf32> -> vector<16x256xf32>
    %c0_3 = arith.constant 0 : index
    %c0_4 = arith.constant 0 : index
    %4 = vector.load %arg3[%c0_3, %c0_4] : memref<1x256xf32, #tpu.memory_space<vmem>>, vector<1x256xf32>
    %5 = vector.broadcast %4 : vector<1x256xf32> to vector<16x256xf32>
    %6 = arith.addf %3, %5 : vector<16x256xf32>
    %cst_5 = arith.constant 0.000000e+00 : f32
    %7 = vector.broadcast %cst_5 : f32 to vector<16x256xf32>
    %8 = arith.subf %7, %6 : vector<16x256xf32>
    %9 = math.exp %8 : vector<16x256xf32>
    %cst_6 = arith.constant 1.000000e+00 : f32
    %10 = vector.broadcast %cst_6 : f32 to vector<16x256xf32>
    %11 = arith.addf %10, %9 : vector<16x256xf32>
    %12 = tpu.reciprocal %11 {approx = true} : vector<16x256xf32> -> vector<16x256xf32>
    %c0_7 = arith.constant 0 : index
    %c0_8 = arith.constant 0 : index
    %13 = vector.load %arg4[%c0_7, %c0_8] : memref<1x256xf32, #tpu.memory_space<vmem>>, vector<1x256xf32>
    %14 = tpu.transpose %12, [1, 0] : vector<16x256xf32> -> vector<256x16xf32>
    %cst_9 = arith.constant dense<0.000000e+00> : vector<1x16xf32>
    %15 = tpu.matmul %13, %14, %cst_9 {dimension_numbers = #tpu.dot_dimension_numbers<[1], [0], [0], [1], [0, 0, 1, 1], [], []>} : vector<1x256xf32>, vector<256x16xf32>, vector<1x16xf32> -> vector<1x16xf32>
    %c0_10 = arith.constant 0 : index
    %c0_11 = arith.constant 0 : index
    %16 = vector.load %arg5[%c0_10, %c0_11] : memref<1x1xf32, #tpu.memory_space<vmem>>, vector<1x1xf32>
    %17 = vector.broadcast %16 : vector<1x1xf32> to vector<1x16xf32>
    %18 = arith.addf %15, %17 : vector<1x16xf32>
    %19 = arith.negf %18 : vector<1x16xf32>
    %20 = math.exp %19 : vector<1x16xf32>
    %cst_12 = arith.constant 1.000000e+00 : f32
    %21 = vector.broadcast %cst_12 : f32 to vector<1x16xf32>
    %22 = arith.addf %21, %20 : vector<1x16xf32>
    %23 = arith.divf %21, %22 : vector<1x16xf32>
    %24 = vector.shape_cast %23 : vector<1x16xf32> to vector<1x1x16xf32>
    %c0_13 = arith.constant 0 : index
    %c0_14 = arith.constant 0 : index
    %c0_15 = arith.constant 0 : index
    %25 = vector.load %arg6[%c0_13, %c0_14, %c0_15] : memref<1x1x16xf32, #tpu.memory_space<vmem>>, vector<1x1x16xf32>
    tpu.vector_store %arg6[%c0_13, %c0_14, %c0_15], %24 {strides = array<i32>} : memref<1x1x16xf32, #tpu.memory_space<vmem>>, vector<1x1x16xf32>,
    return
  }
  func.func @transform_0(%arg0: i32) -> (i32, i32) {
    %c0_i32 = arith.constant 0 : i32
    %c0_i32_0 = arith.constant 0 : i32
    return %arg0, %c0_i32 : i32, i32
  }
  func.func @transform_1(%arg0: i32) -> (i32, i32) {
    %c0_i32 = arith.constant 0 : i32
    %c0_i32_0 = arith.constant 0 : i32
    %c0_i32_1 = arith.constant 0 : i32
    return %c0_i32, %c0_i32_0 : i32, i32
  }
  func.func @transform_2(%arg0: i32) -> (i32, i32) {
    %c0_i32 = arith.constant 0 : i32
    %c0_i32_0 = arith.constant 0 : i32
    %c0_i32_1 = arith.constant 0 : i32
    return %c0_i32, %c0_i32_0 : i32, i32
  }
  func.func @transform_3(%arg0: i32) -> (i32, i32) {
    %c0_i32 = arith.constant 0 : i32
    %c0_i32_0 = arith.constant 0 : i32
    %c0_i32_1 = arith.constant 0 : i32
    return %c0_i32, %c0_i32_0 : i32, i32
  }
  func.func @transform_4(%arg0: i32) -> (i32, i32) {
    %c0_i32 = arith.constant 0 : i32
    %c0_i32_0 = arith.constant 0 : i32
    %c0_i32_1 = arith.constant 0 : i32
    return %c0_i32, %c0_i32_0 : i32, i32
  }
  func.func @transform_5(%arg0: i32) -> (i32, i32, i32) {
    %c0_i32 = arith.constant 0 : i32
    %c0_i32_0 = arith.constant 0 : i32
    %c0_i32_1 = arith.constant 0 : i32
    return %arg0, %c0_i32, %c0_i32_0 : i32, i32, i32
  }
}

</mosaic_0001>

<bundles_post_ra>
// kernel: tpu_custom_call.1
= control target key start
LH: loop header
LB: loop body
LE: loop exit
PB: predicated region body
PF: predicated region fallthrough
CT: control target
= control target key end

     0   :  { %s2265_s0 = inlined_call_operand.hbm [shape: f32[20,784], index: 0, kind: input, shape index: {}]   ;;  %s2266_s1 = inlined_call_operand.hbm [shape: bf16[784,256], index: 1, kind: input, shape index: {}]   ;;  %s2267_s2 = inlined_call_operand.vmem [shape: f32[1,256], index: 2, kind: input, shape index: {}]   ;;  %s2268_s3 = inlined_call_operand.vmem [shape: f32[1,256], index: 3, kind: input, shape index: {}]   ;;  %s2269_s4 = inlined_call_operand.<no memory space> [shape: f32[1,1], index: 4, kind: input, shape index: {}]   ;;  %s2270_s5 = inlined_call_operand.hbm [shape: f32[2,1,16], index: 5, kind: output, shape index: {}]  }
   0x1   :  { %v10_v0 = vstv %s2269_s4 }
   0x2   :  { %11 = vst [vmem:[#allocation2] sm:$0x1] %v10_v0 }
   0x3   :  { %12 = vsyncpa [#allocation4], 0 }
   0x4   :  { %14 = vsyncpa [#allocation4 + $0x1], 0 }
   0x5   :  { %15 = vsyncpa [#allocation7], 0 }
   0x6   :  { %16 = vsyncpa [#allocation5], 0 }
   0x7   :  { %18 = vsyncpa [#allocation5 + $0x1], 0  ;;  %s2046_s20 = smov 0   ;;  %s2048_s21 = smov 0  }
   0x8   :  { %s2050_s22 = smov 0   ;;  %s2052_s23 = smov 0  }
   0x9 LB: > { %s2067_s4 = sadd.s32 4294967295, %s2004_s23   ;;  %s1277_s24 = sadd.s32 4294967294, %s2004_s23   ;;  %s2004_s23 = sphi %s2052_s23, %s2286_s23   ;;  %s2000_s22 = sphi %s2050_s22, %s2285_s22   ;;  %s1996_s21 = sphi %s2048_s21, %s2284_s21   ;;  %s1992_s20 = sphi %s2046_s20, %s2283_s20  }
   0xa   : > { %s2071_s25 = sadd.s32 1, %s2004_s23   ;;  %s31_s26 = sadd.s32 1, %s2000_s22 }
   0xb   : > { %s28_s27 = ssub.s32 %s2004_s23, %s2071_s25  ;;  %p38_p0 = scmp.ne.s32.totalorder %s2000_s22, %s1996_s21 }
   0xc   : > { %p29_p1 = scmp.eq.s32.totalorder %s28_s27, 0  ;;  %p39_p2 = scmp.eq.s32.totalorder %s2004_s23, 0 }
   0xd   : > { %p44_p3 = scmp.ne.s32.totalorder %s1996_s21, %s1992_s20  ;;  %p2272_p4 = scmp.eq.s32.totalorder %s2067_s4, 0 }
   0xe   : > { %s2083_s28 = scalar_select %p29_p1, %s2000_s22, %s31_s26  }
   0xf   : > { %p2085_p5 = por %p39_p2, %p38_p0  ;;  %p2091_p6 = por %p2272_p4, %p44_p3 }
  0x10   : > { %p152_p7 = scmp.eq.s32.totalorder %s2067_s4, 1  ;;  %p158_p8 = scmp.eq.s32.totalorder %s1277_s24, 1 }
  0x11   : > { %p1278_p9 = scmp.ge.s32.totalorder %s2004_s23, 1  ;;  %p165_p10 = scmp.lt.s32.totalorder %s2004_s23, 3 }
  0x12   : > { %p2098_p11 = por %p152_p7, %p38_p0  ;;  %p2102_p12 = por %p158_p8, %p44_p3 }
  0x13   : > { %p2106_p13 = pnand %p1278_p9, %p165_p10  ;;  %s176_s11 = sshll.u32 %s2266_s1, 4  ;;  %s177_s11 = int_to_ptr.hbm [resolvable:$true] %s176_s11 }
  0x14   : > { %s2276_s7 = scalar_select %p2102_p12, 1, 0 }
  0x15   : > { %p1795_p1 = pneg %p2106_p13  ;;  %s2006_s12 = smov [#allocation6]  }
  0x16   : > { %s178_s13 = sshll.u32 %s2006_s12, 4  ;;  %s2007_s14 = smov 128   ;;  %s179_s13 = int_to_ptr.vmem [resolvable:$true] %s178_s13 }
  0x17   : > { %p1796_p0 = pnand %p1795_p1, %p2272_p4  ;;  %s2008_s15 = smov 8  }
  0x18   : > { %p2271_p2 = scmp.ge.s32.totalorder %s2004_s23, 2 }
  0x19   : > { %1798 = dma.hbm_to_vmem [thread:$0]  (!%p1796_p0), %s177_s11, 12544, %s179_s13, [#allocation7], %s2007_s14, %s2007_s14, %s2008_s15  }
  0x1a   : > { %197 = sbr.rel (%p2271_p2) target bundleno = 72 (0x48), region = 32 }
  0x1f   : > { %200 = sbr.rel (!%p2085_p5) target bundleno = 72 (0x48), region = 36  ;;  %s201_s16 = sand.u32 (%p2085_p5), 1, %s2000_s22  }
  0x20   : > { %s1281_s17 = sshll.u32 (%p2085_p5), %s2004_s23, 1  ;;  %s1785_s18 = smul.u32 (%p2085_p5), 112, %s201_s16 }
  0x21   : > { %s207_s19 = ssub.s32 (%p2085_p5), 3, %s1281_s17  ;;  %s2124_s9 = scalar_lea.sflag (%p2085_p5), [#allocation4], %s201_s16 }
  0x22   : > { %p208_p3 = scmp.lt.s32.totalorder (%p2085_p5), %s207_s19, 2  ;;  %s205_s10 = scalar_lea.vmem (%p2085_p5), [#allocation3], %s1785_s18 }
  0x24   : > { %s2288_s19 = smov (!%p208_p3, %s207_s19), 2 }
  0x25   : > { %s1283_s24 = smul.u32 56, %s2288_s19 }
  0x27   : > { %s212_s26 = ssub.s32 112, %s1283_s24 }
  0x28   : > { %s213_s27 = sshll.u32 %s212_s26, 4 }
  0x29   : > { %214 = vsyncadd %s2124_s9, %s213_s27  ;;  %p2127_p7 = scmp.ne.s32.totalorder %s1283_s24, 0  ;;  %s1786_s11 = smul.u32 112, %s2004_s23 }
  0x2a   : > { %s2132_s12 = sshll.u32 %s205_s10, 4  ;;  %s2134_s13 = smul.u32 896, %s2288_s19  ;;  %s223_s12 = int_to_ptr.vmem [resolvable:$true] %s2132_s12 }
  0x2b   : > { %s218_s16 = scalar_lea.hbm %s2265_s0, %s1786_s11  ;;  %s1906_s11 = scalar_lea.hbm %s2265_s0, 168 }
  0x2c   : > { %s220_s17 = sshll.u32 %s218_s16, 4  ;;  %s1897_s24 = sshrl.u32 %s2134_s13, 4  ;;  %s2140_s17 = int_to_ptr.hbm [resolvable:$true] %s220_s17 }
  0x2d   : > { %s1895_s18 = sshra.s32 %s2140_s17, 4  ;;  %s1933_s26 = sshll.u32 %s1897_s24, 4  ;;  %s1896_s18 = int_to_ptr.hbm [resolvable:$true] %s1895_s18 }
  0x2e   : > { %p1899_p5 = scmp.ne.s32.totalorder %s1933_s26, %s2134_s13  ;;  %s1900_s27 = sadd.s32 1, %s1897_s24 }
  0x2f   : > { %p1907_p1 = scmp.lt.s32.totalorder %s1896_s18, %s2265_s0 }
  0x30   : > { %s2290_s27 = smov (!%p1899_p5, %s1900_s27), %s1897_s24 }
  0x31   : > { %s1902_s19 = scalar_lea.hbm %s1896_s18, %s2290_s27 }
  0x32   : > { %p1903_p8 = scmp.ne.s32.totalorder %s1896_s18, %s1902_s19  ;;  %p1908_p0 = scmp.lt.s32.totalorder %s1906_s11, %s1902_s19 }
  0x34   : > { %p1904_p9 = pnand %p1903_p8, %p2127_p7  ;;  %p1909_p3 = por %p1908_p0, %p1907_p1 }
  0x36   : > { %p1905_p10 = pneg %p1904_p9 }
  0x38   : > { %p1910_p2 = pnand %p1909_p3, %p1905_p10 }
  0x3a   : > { %1913 = shalt.err (!%p1910_p2)
}
  0x3b   : > { %s1914_s24 = sshra.s32 %s223_s12, 4  ;;  %s2009_s10 = smov [#allocation3]   ;;  %s1915_s24 = int_to_ptr.vmem [resolvable:$true] %s1914_s24 }
  0x3c   : > { %s1921_s26 = scalar_lea.vmem %s1915_s24, %s2290_s27  ;;  %s1925_s14 = scalar_lea.vmem %s2009_s10, 224 }
  0x3d   : > { %p1922_p5 = scmp.ne.s32.totalorder %s1915_s24, %s1921_s26  ;;  %p1927_p4 = scmp.lt.s32.totalorder %s1925_s14, %s1921_s26 }
  0x3f   : > { %p1923_p8 = pnand %p1922_p5, %p2127_p7 }
  0x41   : > { %p1924_p9 = pneg %p1923_p8 }
  0x43   : > { %p1929_p12 = pnand %p1927_p4, %p1924_p9 }
  0x45   : > { %1932 = shalt.err (!%p1929_p12)
}
  0x46   : > { %s2010_s18 = smov 896   ;;  %s2011_s19 = smov 56  }
  0x47   : > { %228 = dma.hbm_to_vmem [thread:$0]  (%p2127_p7), %s2140_s17, %s2134_s13, %s223_s12, %s2124_s9, %s2010_s18, %s2010_s18, %s2011_s19  }
  0x48 PF: > { %234 = sbr.rel (%p2106_p13) target bundleno = 523 (0x20b), region = 40  ;;  %s2167_s27 = sand.u32 (!%p2106_p13), 1, %s1996_s21  }
  0x49   : > { %s1787_s11 = smul.u32 (!%p2106_p13), 112, %s2167_s27  ;;  %s237_s15 = scalar_lea.sflag (!%p2106_p13), [#allocation4], %s2167_s27 }
  0x4b   : > { %s2171_s16 = scalar_lea.vmem (!%p2106_p13), [#allocation3], %s1787_s11 }
  0x4d   : > { %1979 = dma.done.wait (%p2091_p6), %s237_s15, 1792  }
  0x4e   : > { %1981 = vsyncadd (%p2091_p6), %s237_s15, 4294965504  ;;  %p2279_p4 = scmp.eq.s32.totalorder %s2067_s4, 0 }
  0x50   : > { %1983 = dma.done.wait (%p2279_p4), [#allocation7], 12544   ;;  %p2280_p12 = pmov %p2279_p4 }
  0x51   : > { %v1348_v1 = vld [vmem:[#allocation6 + $0x70] sm:$0xf]  ;;  %v1702_v2 = vld [vmem:[#allocation6 + $0x74] sm:$0xf0]  ;;  %v1340_v12 = vld [vmem:[#allocation6 + $0x60] sm:$0xf]  ;;  %s1197_s17 = scalar_lea.hbm %s2270_s5, %s2067_s4 }
  0x52   : > { %1985 = vsyncadd (%p2280_p12), [#allocation7], 4294954752  ;;  %v1476_v3 = vld [vmem:[#allocation6 + $0x170] sm:$0xf]  ;;  %v1349_v4 = vor.u32 %v1702_v2, %v1348_v1  ;;  %v1734_v5 = vld [vmem:[#allocation6 + $0x174] sm:$0xf0] }
  0x53   : > { %v1540_v6 = vld [vmem:[#allocation6 + $0x1f0] sm:$0xf]  ;;  %v1750_v7 = vld [vmem:[#allocation6 + $0x1f4] sm:$0xf0]  ;;  %v1477_v8 = vor.u32 %v1734_v5, %v1476_v3  ;;  %v1700_v14 = vld [vmem:[#allocation6 + $0x64] sm:$0xf0] }
  0x54   : > { %v1541_v9 = vor.u32 %v1750_v7, %v1540_v6  ;;  %v1412_v10 = vld [vmem:[#allocation6 + $0xf0] sm:$0xf]  ;;  %v1718_v11 = vld [vmem:[#allocation6 + $0xf4] sm:$0xf0]  ;;  %898 = vmatpush.bf16.msra.mxu0 %v1349_v4  ;;  %v1468_v15 = vld [vmem:[#allocation6 + $0x160] sm:$0xf]  ;;  %v1341_v17 = vor.u32 %v1700_v14, %v1340_v12 }
  0x55   : > { %v1413_v13 = vor.u32 %v1718_v11, %v1412_v10  ;;  %v1732_v16 = vld [vmem:[#allocation6 + $0x164] sm:$0xf0]  ;;  %926 = vmatpush.bf16.msra.mxu2 %v1477_v8  ;;  %v1532_v19 = vld [vmem:[#allocation6 + $0x1e0] sm:$0xf]  ;;  %v1332_v24 = vld [vmem:[#allocation6 + $0x50] sm:$0xf] }
  0x56   : > { %940 = vmatpush.bf16.msra.mxu3 %v1541_v9  ;;  %v1469_v18 = vor.u32 %v1732_v16, %v1468_v15  ;;  %v1748_v20 = vld [vmem:[#allocation6 + $0x1e4] sm:$0xf0]  ;;  %v1404_v21 = vld [vmem:[#allocation6 + $0xe0] sm:$0xf]  ;;  %v1698_v25 = vld [vmem:[#allocation6 + $0x54] sm:$0xf0] }
  0x57   : > { %912 = vmatpush.bf16.msra.mxu1 %v1413_v13  ;;  %v1533_v22 = vor.u32 %v1748_v20, %v1532_v19  ;;  %v1716_v23 = vld [vmem:[#allocation6 + $0xe4] sm:$0xf0]  ;;  %v1460_v27 = vld [vmem:[#allocation6 + $0x150] sm:$0xf]  ;;  %v1730_v28 = vld [vmem:[#allocation6 + $0x154] sm:$0xf0]  ;;  %v1333_v30 = vor.u32 %v1698_v25, %v1332_v24 }
  0x58   : > { %v1405_v26 = vor.u32 %v1716_v23, %v1404_v21  ;;  %v1524_v29 = vld [vmem:[#allocation6 + $0x1d0] sm:$0xf]  ;;  %899 = vmatpush.bf16.msra.mxu0 %v1341_v17  ;;  %v1746_v31 = vld [vmem:[#allocation6 + $0x1d4] sm:$0xf0]  ;;  %v1461_v34 = vor.u32 %v1730_v28, %v1460_v27  ;;  %v1324_v36 = vld [vmem:[#allocation6 + $0x40] sm:$0xf] }
  0x59   : > { %v1396_v32 = vld [vmem:[#allocation6 + $0xd0] sm:$0xf]  ;;  %v1714_v33 = vld [vmem:[#allocation6 + $0xd4] sm:$0xf0]  ;;  %927 = vmatpush.bf16.msra.mxu2 %v1469_v18  ;;  %v1525_v35 = vor.u32 %v1746_v31, %v1524_v29  ;;  %v1696_v37 = vld [vmem:[#allocation6 + $0x44] sm:$0xf0] }
  0x5a   : > { %941 = vmatpush.bf16.msra.mxu3 %v1533_v22  ;;  %v1452_v38 = vld [vmem:[#allocation6 + $0x140] sm:$0xf]  ;;  %v1397_v39 = vor.u32 %v1714_v33, %v1396_v32  ;;  %v1728_v40 = vld [vmem:[#allocation6 + $0x144] sm:$0xf0]  ;;  %v1325_v45 = vor.u32 %v1696_v37, %v1324_v36  ;;  %v1316_v48 = vld [vmem:[#allocation6 + $0x30] sm:$0xf] }
  0x5b   : > { %913 = vmatpush.bf16.msra.mxu1 %v1405_v26  ;;  %v1516_v41 = vld [vmem:[#allocation6 + $0x1c0] sm:$0xf]  ;;  %v1744_v42 = vld [vmem:[#allocation6 + $0x1c4] sm:$0xf0]  ;;  %v1453_v46 = vor.u32 %v1728_v40, %v1452_v38  ;;  %v1694_v49 = vld [vmem:[#allocation6 + $0x34] sm:$0xf0] }
  0x5c   : > { %v1388_v43 = vld [vmem:[#allocation6 + $0xc0] sm:$0xf]  ;;  %v1712_v44 = vld [vmem:[#allocation6 + $0xc4] sm:$0xf0]  ;;  %900 = vmatpush.bf16.msra.mxu0 %v1333_v30  ;;  %v1517_v47 = vor.u32 %v1744_v42, %v1516_v41  ;;  %v1444_v50 = vld [vmem:[#allocation6 + $0x130] sm:$0xf]  ;;  %v1317_v57 = vor.u32 %v1694_v49, %v1316_v48 }
  0x5d   : > { %928 = vmatpush.bf16.msra.mxu2 %v1461_v34  ;;  %v1389_v51 = vor.u32 %v1712_v44, %v1388_v43  ;;  %v1726_v52 = vld [vmem:[#allocation6 + $0x134] sm:$0xf0]  ;;  %v1508_v53 = vld [vmem:[#allocation6 + $0x1b0] sm:$0xf]  ;;  %v1308_v60 = vld [vmem:[#allocation6 + $0x20] sm:$0xf] }
  0x5e   : > { %942 = vmatpush.bf16.msra.mxu3 %v1525_v35  ;;  %v1742_v54 = vld [vmem:[#allocation6 + $0x1b4] sm:$0xf0]  ;;  %v1380_v55 = vld [vmem:[#allocation6 + $0xb0] sm:$0xf]  ;;  %v1445_v58 = vor.u32 %v1726_v52, %v1444_v50  ;;  %v1692_v61 = vld [vmem:[#allocation6 + $0x24] sm:$0xf0] }
  0x5f   : > { %914 = vmatpush.bf16.msra.mxu1 %v1397_v39  ;;  %v1710_v56 = vld [vmem:[#allocation6 + $0xb4] sm:$0xf0]  ;;  %v1509_v59 = vor.u32 %v1742_v54, %v1508_v53  ;;  %v1436_v62 = vld [vmem:[#allocation6 + $0x120] sm:$0xf]  ;;  %v1724_v0 = vld [vmem:[#allocation6 + $0x124] sm:$0xf0]  ;;  %v1309_v5 = vor.u32 %v1692_v61, %v1308_v60 }
  0x60   : > { %901 = vmatpush.bf16.msra.mxu0 %v1325_v45  ;;  %v1381_v63 = vor.u32 %v1710_v56, %v1380_v55  ;;  %v1500_v1 = vld [vmem:[#allocation6 + $0x1a0] sm:$0xf]  ;;  %v1740_v2 = vld [vmem:[#allocation6 + $0x1a4] sm:$0xf0]  ;;  %v1300_v6 = vld [vmem:[#allocation6 + $0x10] sm:$0xf]  ;;  %v1437_v7 = vor.u32 %v1724_v0, %v1436_v62 }
  0x61   : > { %929 = vmatpush.bf16.msra.mxu2 %v1453_v46  ;;  %v1372_v3 = vld [vmem:[#allocation6 + $0xa0] sm:$0xf]  ;;  %v1708_v4 = vld [vmem:[#allocation6 + $0xa4] sm:$0xf0]  ;;  %v1501_v8 = vor.u32 %v1740_v2, %v1500_v1  ;;  %v1690_v9 = vld [vmem:[#allocation6 + $0x14] sm:$0xf0] }
  0x62   : > { %943 = vmatpush.bf16.msra.mxu3 %v1517_v47  ;;  %v1428_v10 = vld [vmem:[#allocation6 + $0x110] sm:$0xf]  ;;  %v1722_v11 = vld [vmem:[#allocation6 + $0x114] sm:$0xf0]  ;;  %v1373_v12 = vor.u32 %v1708_v4, %v1372_v3  ;;  %v1292_v17 = vld [vmem:[#allocation6] sm:$0xf]  ;;  %v1301_v19 = vor.u32 %v1690_v9, %v1300_v6 }
  0x63   : > { %915 = vmatpush.bf16.msra.mxu1 %v1389_v51  ;;  %v1492_v13 = vld [vmem:[#allocation6 + $0x190] sm:$0xf]  ;;  %v1738_v14 = vld [vmem:[#allocation6 + $0x194] sm:$0xf0]  ;;  %v1688_v18 = vld [vmem:[#allocation6 + $0x4] sm:$0xf0]  ;;  %v1429_v24 = vor.u32 %v1722_v11, %v1428_v10 }
  0x64   : > { %902 = vmatpush.bf16.msra.mxu0 %v1317_v57  ;;  %v1364_v15 = vld [vmem:[#allocation6 + $0x90] sm:$0xf]  ;;  %v1706_v16 = vld [vmem:[#allocation6 + $0x94] sm:$0xf0]  ;;  %v1420_v20 = vld [vmem:[#allocation6 + $0x100] sm:$0xf]  ;;  %v1493_v25 = vor.u32 %v1738_v14, %v1492_v13  ;;  %v1293_v36 = vor.u32 %v1688_v18, %v1292_v17 }
  0x65   : > { %930 = vmatpush.bf16.msra.mxu2 %v1445_v58  ;;  %v1720_v21 = vld [vmem:[#allocation6 + $0x104] sm:$0xf0]  ;;  %v1484_v22 = vld [vmem:[#allocation6 + $0x180] sm:$0xf]  ;;  %v1604_v26 = vld [vmem:[#allocation6 + $0x270] sm:$0xf]  ;;  %v1365_v29 = vor.u32 %v1706_v16, %v1364_v15 }
  0x66   : > { %944 = vmatpush.bf16.msra.mxu3 %v1509_v59  ;;  %v1736_v23 = vld [vmem:[#allocation6 + $0x184] sm:$0xf0]  ;;  %v1766_v27 = vld [vmem:[#allocation6 + $0x274] sm:$0xf0]  ;;  %v1701_v28 = vld [vmem:[#allocation6 + $0x74] sm:$0xf]  ;;  %v1421_v40 = vor.u32 %v1720_v21, %v1420_v20 }
  0x67   : > { %916 = vmatpush.bf16.msra.mxu1 %v1381_v63  ;;  %v1350_v30 = vld [vmem:[#allocation6 + $0x78] sm:$0xf0]  ;;  %v1356_v31 = vld [vmem:[#allocation6 + $0x80] sm:$0xf]  ;;  %v1704_v32 = vld [vmem:[#allocation6 + $0x84] sm:$0xf0]  ;;  %v1485_v41 = vor.u32 %v1736_v23, %v1484_v22  ;;  %v1605_v45 = vor.u32 %v1766_v27, %v1604_v26 }
  0x68   : > { %903 = vmatpush.bf16.msra.mxu0 %v1309_v5  ;;  %v281_v33 = vld [vmem:[%s2171_s16 + $0x10] sm:$0xff]  ;;  %v288_v34 = vld [vmem:[%s2171_s16 + $0x48] sm:$0xff]  ;;  %v279_v44 = vld [vmem:[%s2171_s16] sm:$0xff]  ;;  %v1353_v46 = vor.u32 %v1701_v28, %v1350_v30  ;;  %v1357_v50 = vor.u32 %v1704_v32, %v1356_v31  ;;  %vm894_vm0 = vcmask 130048   ;;  %s271_s24 = scalar_lea.vmem [#allocation8], %s2167_s27  ;;  %s1201_s10 = sshll.u32 %s1197_s17, 4  ;;  %s1202_s10 = int_to_ptr.hbm [resolvable:$true] %s1201_s10 }
  0x69   : > { %931 = vmatpush.bf16.msra.mxu2 %v1437_v7  ;;  %v1668_v35 = vld [vmem:[#allocation6 + $0x2f0] sm:$0xf]  ;;  %v1782_v37 = vld [vmem:[#allocation6 + $0x2f4] sm:$0xf0]  ;;  %v1676_v38 = vld [vmem:[#allocation6 + $0x300] sm:$0xf]  ;;  %v2187_v55 = vpack.c.bf16 %v288_v34, %v281_v33 }
  0x6a   : > { %945 = vmatpush.bf16.msra.mxu3 %v1501_v8  ;;  %v1784_v39 = vld [vmem:[#allocation6 + $0x304] sm:$0xf0]  ;;  %v1717_v42 = vld [vmem:[#allocation6 + $0xf4] sm:$0xf]  ;;  %v1414_v43 = vld [vmem:[#allocation6 + $0xf8] sm:$0xf0]  ;;  %v1669_v56 = vor.u32 %v1782_v37, %v1668_v35 }
  0x6b   : > { %917 = vmatpush.bf16.msra.mxu1 %v1373_v12  ;;  %v286_v47 = vld [vmem:[%s2171_s16 + $0x38] sm:$0xff]  ;;  %v289_v49 = vld [vmem:[%s2171_s16 + $0x50] sm:$0xff]  ;;  %v1677_v51 = vor.u32 %v1784_v39, %v1676_v38  ;;  %v280_v58 = vld [vmem:[%s2171_s16 + $0x8] sm:$0xff]  ;;  %v1417_v60 = vor.u32 %v1717_v42, %v1414_v43  ;;  %s1199_s26 = sshll.u32 %s271_s24, 4  ;;  %vm1186_vm4 = vcmask 122880   ;;  %s1189_s4 = scalar_lea.sflag [#allocation5], %s2167_s27  ;;  %s1200_s26 = int_to_ptr.vmem [resolvable:$true] %s1199_s26 }
  0x6c   : > { %904 = vmatpush.bf16.msra.mxu0 %v1301_v19  ;;  %v282_v48 = vld [vmem:[%s2171_s16 + $0x18] sm:$0xff]  ;;  %v1596_v52 = vld [vmem:[#allocation6 + $0x260] sm:$0xf]  ;;  %v1699_v54 = vld [vmem:[#allocation6 + $0x64] sm:$0xf]  ;;  %v2191_v61 = vpack.c.bf16 %v286_v47, %v279_v44  ;;  %s1948_s14 = sshra.s32 %s1202_s10, 4  ;;  %s1949_s14 = int_to_ptr.hbm [resolvable:$true] %s1948_s14 }
  0x6d   : > { %932 = vmatpush.bf16.msra.mxu2 %v1429_v24  ;;  %v1764_v53 = vld [vmem:[#allocation6 + $0x264] sm:$0xf0]  ;;  %v1342_v57 = vld [vmem:[#allocation6 + $0x68] sm:$0xf0]  ;;  %v287_v59 = vld [vmem:[%s2171_s16 + $0x40] sm:$0xff]  ;;  %v2193_v0 = vpack.c.bf16 %v289_v49, %v282_v48  ;;  %s1950_s18 = scalar_lea.hbm %s1949_s14, 1  ;;  %p1955_p7 = scmp.lt.s32.totalorder %s1949_s14, %s2270_s5 }
  0x6e   : > { %946 = vmatpush.bf16.msra.mxu3 %v1493_v25  ;;  %v1660_v62 = vld [vmem:[#allocation6 + $0x2e0] sm:$0xf]  ;;  %v1780_v63 = vld [vmem:[#allocation6 + $0x2e4] sm:$0xf0]  ;;  %v1597_v1 = vor.u32 %v1764_v53, %v1596_v52  ;;  %v1715_v2 = vld [vmem:[#allocation6 + $0xe4] sm:$0xf]  ;;  %v1345_v4 = vor.u32 %v1699_v54, %v1342_v57  ;;  %v2195_v5 = vpack.c.bf16 %v287_v59, %v280_v58  ;;  %p1951_p6 = scmp.ne.s32.totalorder %s1949_s14, %s1950_s18 }
  0x6f   : > { %918 = vmatpush.bf16.msra.mxu1 %v1365_v29  ;;  %v1406_v3 = vld [vmem:[#allocation6 + $0xe8] sm:$0xf0]  ;;  %v1588_v6 = vld [vmem:[#allocation6 + $0x250] sm:$0xf]  ;;  %v1762_v7 = vld [vmem:[#allocation6 + $0x254] sm:$0xf0]  ;;  %v1661_v8 = vor.u32 %v1780_v63, %v1660_v62 }
  0x70   : > { %905 = vmatpush.bf16.msra.mxu0 %v1293_v36  ;;  %v1697_v9 = vld [vmem:[#allocation6 + $0x54] sm:$0xf]  ;;  %v1334_v10 = vld [vmem:[#allocation6 + $0x58] sm:$0xf0]  ;;  %v1409_v11 = vor.u32 %v1715_v2, %v1406_v3  ;;  %v1652_v12 = vld [vmem:[#allocation6 + $0x2d0] sm:$0xf]  ;;  %v1589_v14 = vor.u32 %v1762_v7, %v1588_v6  ;;  %p1952_p13 = pnand %p1951_p6, %p2098_p11 }
  0x71   : > { %933 = vmatpush.bf16.msra.mxu2 %v1421_v40  ;;  %v1778_v13 = vld [vmem:[#allocation6 + $0x2d4] sm:$0xf0]  ;;  %v1713_v15 = vld [vmem:[#allocation6 + $0xd4] sm:$0xf]  ;;  %v1398_v16 = vld [vmem:[#allocation6 + $0xd8] sm:$0xf0]  ;;  %v1337_v17 = vor.u32 %v1697_v9, %v1334_v10 }
  0x72   : > { %947 = vmatpush.bf16.msra.mxu3 %v1485_v41  ;;  %v1580_v18 = vld [vmem:[#allocation6 + $0x240] sm:$0xf]  ;;  %v1760_v19 = vld [vmem:[#allocation6 + $0x244] sm:$0xf0]  ;;  %v1653_v20 = vor.u32 %v1778_v13, %v1652_v12  ;;  %v1695_v21 = vld [vmem:[#allocation6 + $0x44] sm:$0xf]  ;;  %v1401_v23 = vor.u32 %v1713_v15, %v1398_v16  ;;  %p1953_p2 = pneg %p1952_p13 }
  0x73   : > { %919 = vmatpush.bf16.msra.mxu1 %v1357_v50  ;;  %906 = vmatmul.bf16.vlgmr.msra.gmra.mxu0 %v2191_v61  ;;  %v1326_v22 = vld [vmem:[#allocation6 + $0x48] sm:$0xf0]  ;;  %v1644_v24 = vld [vmem:[#allocation6 + $0x2c0] sm:$0xf]  ;;  %v1776_v25 = vld [vmem:[#allocation6 + $0x2c4] sm:$0xf0]  ;;  %v1581_v26 = vor.u32 %v1760_v19, %v1580_v18 }
  0x74   : > { %954 = vmatpush.bf16.msrb.mxu0 %v1605_v45  ;;  %934 = vmatmul.bf16.vlgmr.msra.gmra.mxu2 %v2187_v55  ;;  %v1711_v27 = vld [vmem:[#allocation6 + $0xc4] sm:$0xf]  ;;  %v1390_v28 = vld [vmem:[#allocation6 + $0xc8] sm:$0xf0]  ;;  %v1329_v29 = vor.u32 %v1695_v21, %v1326_v22  ;;  %v1572_v30 = vld [vmem:[#allocation6 + $0x230] sm:$0xf]  ;;  %v1645_v32 = vor.u32 %v1776_v25, %v1644_v24 }
  0x75   : > { %989 = vmatpush.bf16.msrb.mxu2 %v1677_v51  ;;  %948 = vmatmul.bf16.vlgmr.msra.gmra.mxu3 %v2193_v0  ;;  %v1758_v31 = vld [vmem:[#allocation6 + $0x234] sm:$0xf0]  ;;  %v1693_v33 = vld [vmem:[#allocation6 + $0x34] sm:$0xf]  ;;  %v1318_v34 = vld [vmem:[#allocation6 + $0x38] sm:$0xf0]  ;;  %v1393_v36 = vor.u32 %v1711_v27, %v1390_v28 }
  0x76   : > { %996 = vmatpush.bf16.msrb.mxu3 %v1353_v46  ;;  %920 = vmatmul.bf16.vlgmr.msra.gmra.mxu1 %v2195_v5  ;;  %v1636_v35 = vld [vmem:[#allocation6 + $0x2b0] sm:$0xf]  ;;  %v1774_v37 = vld [vmem:[#allocation6 + $0x2b4] sm:$0xf0]  ;;  %v1573_v40 = vor.u32 %v1758_v31, %v1572_v30  ;;  %v1709_v41 = vld [vmem:[#allocation6 + $0xb4] sm:$0xf]  ;;  %v1321_v43 = vor.u32 %v1693_v33, %v1318_v34 }
  0x77   : > { %968 = vmatpush.bf16.msrb.mxu1 %v1669_v56  ;;  %v285_v38 = vld [vmem:[%s2171_s16 + $0x30] sm:$0xff]  ;;  %v292_v39 = vld [vmem:[%s2171_s16 + $0x68] sm:$0xff]  ;;  %v1637_v46 = vor.u32 %v1774_v37, %v1636_v35  ;;  %v283_v21 = vld [vmem:[%s2171_s16 + $0x20] sm:$0xff]  ;;  %s1954_s15 = scalar_lea.hbm %s2270_s5, 2 }
  0x78   : > { %955 = vmatpush.bf16.msrb.mxu0 %v1597_v1  ;;  %v1382_v42 = vld [vmem:[#allocation6 + $0xb8] sm:$0xf0]  ;;  %v1564_v44 = vld [vmem:[#allocation6 + $0x220] sm:$0xf]  ;;  %v1756_v45 = vld [vmem:[#allocation6 + $0x224] sm:$0xf0]  ;;  %v2203_v49 = vpack.c.bf16 %v292_v39, %v285_v38  ;;  %p1956_p10 = scmp.lt.s32.totalorder %s1954_s15, %s1950_s18 }
  0x79   : > { %1010 = vmatpush.bf16.msra.mxu2 %v1417_v60  ;;  %v1691_v47 = vld [vmem:[#allocation6 + $0x24] sm:$0xf]  ;;  %v1310_v48 = vld [vmem:[#allocation6 + $0x28] sm:$0xf0]  ;;  %v1385_v50 = vor.u32 %v1709_v41, %v1382_v42  ;;  %v1628_v51 = vld [vmem:[#allocation6 + $0x2a0] sm:$0xf]  ;;  %v1565_v53 = vor.u32 %v1756_v45, %v1564_v44 }
  0x7a   : > { %997 = vmatpush.bf16.msrb.mxu3 %v1345_v4  ;;  %v1772_v52 = vld [vmem:[#allocation6 + $0x2a4] sm:$0xf0]  ;;  %v1707_v54 = vld [vmem:[#allocation6 + $0xa4] sm:$0xf]  ;;  %v1374_v56 = vld [vmem:[#allocation6 + $0xa8] sm:$0xf0]  ;;  %v1313_v57 = vor.u32 %v1691_v47, %v1310_v48  ;;  %p1957_p1 = por %p1956_p10, %p1955_p7 }
  0x7b   : > { %969 = vmatpush.bf16.msrb.mxu1 %v1661_v8  ;;  %v1556_v58 = vld [vmem:[#allocation6 + $0x210] sm:$0xf]  ;;  %v1754_v59 = vld [vmem:[#allocation6 + $0x214] sm:$0xf0]  ;;  %v1689_v60 = vld [vmem:[#allocation6 + $0x14] sm:$0xf]  ;;  %v1629_v62 = vor.u32 %v1772_v52, %v1628_v51  ;;  %v1377_v3 = vor.u32 %v1707_v54, %v1374_v56 }
  0x7c   : > { %956 = vmatpush.bf16.msrb.mxu0 %v1589_v14  ;;  %v1302_v63 = vld [vmem:[#allocation6 + $0x18] sm:$0xf0]  ;;  %v1620_v1 = vld [vmem:[#allocation6 + $0x290] sm:$0xf]  ;;  %v1770_v2 = vld [vmem:[#allocation6 + $0x294] sm:$0xf0]  ;;  %v1557_v8 = vor.u32 %v1754_v59, %v1556_v58  ;;  %p1958_p0 = pnand %p1957_p1, %p1953_p2 }
  0x7d   : > { %1011 = vmatpush.bf16.msra.mxu2 %v1409_v11  ;;  %v1705_v4 = vld [vmem:[#allocation6 + $0x94] sm:$0xf]  ;;  %v1366_v6 = vld [vmem:[#allocation6 + $0x98] sm:$0xf0]  ;;  %v1548_v7 = vld [vmem:[#allocation6 + $0x200] sm:$0xf]  ;;  %v1305_v12 = vor.u32 %v1689_v60, %v1302_v63  ;;  %v1621_v16 = vor.u32 %v1770_v2, %v1620_v1 }
  0x7e   : > { %998 = vmatpush.bf16.msrb.mxu3 %v1337_v17  ;;  %v1752_v9 = vld [vmem:[#allocation6 + $0x204] sm:$0xf0]  ;;  %v1687_v10 = vld [vmem:[#allocation6 + $0x4] sm:$0xf]  ;;  %v1294_v11 = vld [vmem:[#allocation6 + $0x8] sm:$0xf0] }
  0x7f   : > { %970 = vmatpush.bf16.msrb.mxu1 %v1653_v20  ;;  %v1733_v13 = vld [vmem:[#allocation6 + $0x174] sm:$0xf]  ;;  %v1478_v14 = vld [vmem:[#allocation6 + $0x178] sm:$0xf0]  ;;  %v1612_v18 = vld [vmem:[#allocation6 + $0x280] sm:$0xf]  ;;  %v1369_v20 = vor.u32 %v1705_v4, %v1366_v6  ;;  %v1549_v24 = vor.u32 %v1752_v9, %v1548_v7  ;;  %v1297_v28 = vor.u32 %v1687_v10, %v1294_v11 }
  0x80   : > { %957 = vmatpush.bf16.msrb.mxu0 %v1581_v26  ;;  %v1765_v15 = vld [vmem:[#allocation6 + $0x274] sm:$0xf]  ;;  %v1606_v17 = vld [vmem:[#allocation6 + $0x278] sm:$0xf0]  ;;  %v1768_v19 = vld [vmem:[#allocation6 + $0x284] sm:$0xf0] }
  0x81   : > { %1012 = vmatpush.bf16.msra.mxu2 %v1401_v23  ;;  %v290_v22 = vld [vmem:[%s2171_s16 + $0x58] sm:$0xff]  ;;  %v1703_v23 = vld [vmem:[#allocation6 + $0x84] sm:$0xf]  ;;  %v1749_v26 = vld [vmem:[#allocation6 + $0x1f4] sm:$0xf]  ;;  %v1609_v33 = vor.u32 %v1765_v15, %v1606_v17  ;;  %v1613_v34 = vor.u32 %v1768_v19, %v1612_v18 }
  0x82   : > { %999 = vmatpush.bf16.msrb.mxu3 %v1329_v29  ;;  %v1358_v25 = vld [vmem:[#allocation6 + $0x88] sm:$0xf0]  ;;  %v1542_v27 = vld [vmem:[#allocation6 + $0x1f8] sm:$0xf0]  ;;  %v1481_v29 = vor.u32 %v1733_v13, %v1478_v14  ;;  %v1781_v30 = vld [vmem:[#allocation6 + $0x2f4] sm:$0xf]  ;;  %v2211_v38 = vpack.c.bf16 %v290_v22, %v283_v21 }
  0x83   : > { %971 = vmatpush.bf16.msrb.mxu1 %v1645_v32  ;;  %v1670_v31 = vld [vmem:[#allocation6 + $0x2f8] sm:$0xf0]  ;;  %v291_v35 = vld [vmem:[%s2171_s16 + $0x60] sm:$0xff]  ;;  %v1470_v37 = vld [vmem:[#allocation6 + $0x168] sm:$0xf0]  ;;  %v1361_v39 = vor.u32 %v1703_v23, %v1358_v25  ;;  %v1545_v42 = vor.u32 %v1749_v26, %v1542_v27 }
  0x84   : > { %958 = vmatpush.bf16.msrb.mxu0 %v1573_v40  ;;  %1682 = vmatmul.msk.bf16.vlgmr.msrb.gmra.mxu2 %vm894_vm0, %v2203_v49  ;;  %v284_v32 = vld [vmem:[%s2171_s16 + $0x28] sm:$0xff]  ;;  %v1763_v40 = vld [vmem:[#allocation6 + $0x264] sm:$0xf]  ;;  %v1729_v52 = vld [vmem:[#allocation6 + $0x154] sm:$0xf] }
  0x85   : > { %1013 = vmatpush.bf16.msra.mxu2 %v1393_v36  ;;  %v1731_v36 = vld [vmem:[#allocation6 + $0x164] sm:$0xf]  ;;  %v1598_v41 = vld [vmem:[#allocation6 + $0x268] sm:$0xf0]  ;;  %v2213_v45 = vpack.c.bf16 %v291_v35, %v284_v32  ;;  %v1761_v54 = vld [vmem:[#allocation6 + $0x254] sm:$0xf] }
  0x86   : > { %1000 = vmatpush.bf16.msrb.mxu3 %v1321_v43  ;;  %v1673_v43 = vor.u32 %v1781_v30, %v1670_v31  ;;  %v1747_v44 = vld [vmem:[#allocation6 + $0x1e4] sm:$0xf]  ;;  %v1534_v47 = vld [vmem:[#allocation6 + $0x1e8] sm:$0xf0]  ;;  %v1601_v51 = vor.u32 %v1763_v40, %v1598_v41  ;;  %v1590_v56 = vld [vmem:[#allocation6 + $0x258] sm:$0xf0] }
  0x87   : > { %972 = vmatpush.bf16.msrb.mxu1 %v1637_v46  ;;  %v1473_v46 = vor.u32 %v1731_v36, %v1470_v37  ;;  %v1779_v48 = vld [vmem:[#allocation6 + $0x2e4] sm:$0xf]  ;;  %v1745_v59 = vld [vmem:[#allocation6 + $0x1d4] sm:$0xf]  ;;  %v1654_v1 = vld [vmem:[#allocation6 + $0x2d8] sm:$0xf0]  ;;  %v1593_v2 = vor.u32 %v1761_v54, %v1590_v56 }
  0x88   : > { %959 = vmatpush.bf16.msrb.mxu0 %v1565_v53  ;;  %v1462_v53 = vld [vmem:[#allocation6 + $0x158] sm:$0xf0]  ;;  %v1777_v63 = vld [vmem:[#allocation6 + $0x2d4] sm:$0xf]  ;;  %v1454_v4 = vld [vmem:[#allocation6 + $0x148] sm:$0xf0] }
  0x89   : > { %1014 = vmatpush.bf16.msra.mxu2 %v1385_v50  ;;  %v1662_v50 = vld [vmem:[#allocation6 + $0x2e8] sm:$0xf0]  ;;  %v1465_v60 = vor.u32 %v1729_v52, %v1462_v53  ;;  %v1759_v6 = vld [vmem:[#allocation6 + $0x244] sm:$0xf]  ;;  %v1657_v9 = vor.u32 %v1777_v63, %v1654_v1  ;;  %v1446_v17 = vld [vmem:[#allocation6 + $0x138] sm:$0xf0] }
  0x8a   : > { %1001 = vmatpush.bf16.msrb.mxu3 %v1313_v57  ;;  %v1537_v57 = vor.u32 %v1747_v44, %v1534_v47  ;;  %v1665_v58 = vor.u32 %v1779_v48, %v1662_v50  ;;  %v1582_v7 = vld [vmem:[#allocation6 + $0x248] sm:$0xf0]  ;;  %v1743_v10 = vld [vmem:[#allocation6 + $0x1c4] sm:$0xf]  ;;  %v1757_v18 = vld [vmem:[#allocation6 + $0x234] sm:$0xf] }
  0x8b   : > { %973 = vmatpush.bf16.msrb.mxu1 %v1629_v62  ;;  %v1526_v62 = vld [vmem:[#allocation6 + $0x1d8] sm:$0xf0]  ;;  %v1775_v13 = vld [vmem:[#allocation6 + $0x2c4] sm:$0xf]  ;;  %v1646_v14 = vld [vmem:[#allocation6 + $0x2c8] sm:$0xf0]  ;;  %v1585_v15 = vor.u32 %v1759_v6, %v1582_v7 }
  0x8c   : > { %960 = vmatpush.bf16.msrb.mxu0 %v1557_v8  ;;  %v1529_v8 = vor.u32 %v1745_v59, %v1526_v62  ;;  %v1510_v22 = vld [vmem:[#allocation6 + $0x1b8] sm:$0xf0]  ;;  %v1773_v23 = vld [vmem:[#allocation6 + $0x2b4] sm:$0xf]  ;;  %v1723_v26 = vld [vmem:[#allocation6 + $0x124] sm:$0xf] }
  0x8d   : > { %1015 = vmatpush.bf16.msra.mxu2 %v1377_v3  ;;  %v1727_v3 = vld [vmem:[#allocation6 + $0x144] sm:$0xf]  ;;  %v1438_v27 = vld [vmem:[#allocation6 + $0x128] sm:$0xf0]  ;;  %v1430_v40 = vld [vmem:[#allocation6 + $0x118] sm:$0xf0] }
  0x8e   : > { %1002 = vmatpush.bf16.msrb.mxu3 %v1305_v12  ;;  %v1457_v11 = vor.u32 %v1727_v3, %v1454_v4  ;;  %v1518_v12 = vld [vmem:[#allocation6 + $0x1c8] sm:$0xf0]  ;;  %v1739_v32 = vld [vmem:[#allocation6 + $0x1a4] sm:$0xf]  ;;  %v1753_v41 = vld [vmem:[#allocation6 + $0x214] sm:$0xf] }
  0x8f   : > { %974 = vmatpush.bf16.msrb.mxu1 %v1621_v16  ;;  %v1725_v16 = vld [vmem:[#allocation6 + $0x134] sm:$0xf]  ;;  %v1521_v19 = vor.u32 %v1743_v10, %v1518_v12  ;;  %v1771_v35 = vld [vmem:[#allocation6 + $0x2a4] sm:$0xf]  ;;  %v1630_v36 = vld [vmem:[#allocation6 + $0x2a8] sm:$0xf0] }
  0x90   : > { %961 = vmatpush.bf16.msrb.mxu0 %v1549_v24  ;;  %v1449_v21 = vor.u32 %v1725_v16, %v1446_v17  ;;  %v1638_v24 = vld [vmem:[#allocation6 + $0x2b8] sm:$0xf0]  ;;  %v1633_v44 = vor.u32 %v1771_v35, %v1630_v36  ;;  %v1769_v50 = vld [vmem:[#allocation6 + $0x294] sm:$0xf]  ;;  %v1719_v53 = vld [vmem:[#allocation6 + $0x104] sm:$0xf] }
  0x91   : > { %1016 = vmatpush.bf16.msra.mxu2 %v1369_v20  ;;  %v1741_v20 = vld [vmem:[#allocation6 + $0x1b4] sm:$0xf]  ;;  %v1641_v31 = vor.u32 %v1773_v23, %v1638_v24  ;;  %v1494_v48 = vld [vmem:[#allocation6 + $0x198] sm:$0xf0]  ;;  %v1422_v54 = vld [vmem:[#allocation6 + $0x108] sm:$0xf0] }
  0x92   : > { %1003 = vmatpush.bf16.msrb.mxu3 %v1297_v28  ;;  %v1755_v28 = vld [vmem:[#allocation6 + $0x224] sm:$0xf]  ;;  %v1513_v30 = vor.u32 %v1741_v20, %v1510_v22  ;;  %v1678_v59 = vld [vmem:[#allocation6 + $0x308] sm:$0xf0]  ;;  %v1425_v63 = vor.u32 %v1719_v53, %v1422_v54  ;;  %v398_v10 = vld [vmem:[%s2267_s2] sm:$0x3] }
  0x93   : > { %975 = vmatpush.bf16.msrb.mxu1 %v1613_v34  ;;  %962 = vmatmul.bf16.vlgmr.msrb.gmra.mxu0 %v2211_v38  ;;  %v1502_v34 = vld [vmem:[#allocation6 + $0x1a8] sm:$0xf0]  ;;  %v1751_v56 = vld [vmem:[#allocation6 + $0x204] sm:$0xf] }
  0x94   : > { %1024 = vmatpush.bf16.msra.mxu0 %v1481_v29  ;;  %v1566_v29 = vld [vmem:[#allocation6 + $0x228] sm:$0xf0]  ;;  %v1735_v1 = vld [vmem:[#allocation6 + $0x184] sm:$0xf] }
  0x95   : > { %1017 = vmatpush.bf16.msra.mxu2 %v1361_v39  ;;  %1004 = vmatmul.bf16.vlgmr.msrb.gmra.mxu3 %v2191_v61  ;;  %v1649_v61 = vor.u32 %v1775_v13, %v1646_v14  ;;  %v1569_v37 = vor.u32 %v1755_v28, %v1566_v29  ;;  %v1721_v39 = vld [vmem:[#allocation6 + $0x114] sm:$0xf]  ;;  %v1767_v4 = vld [vmem:[#allocation6 + $0x284] sm:$0xf]  ;;  %v1614_v6 = vld [vmem:[#allocation6 + $0x288] sm:$0xf0] }
  0x96   : > { %1052 = vmatpush.bf16.msra.mxu3 %v1609_v33  ;;  %976 = vmatmul.bf16.vlgmr.msrb.gmra.mxu1 %v2213_v45  ;;  %v1441_v33 = vor.u32 %v1723_v26, %v1438_v27  ;;  %v1433_v47 = vor.u32 %v1721_v39, %v1430_v40  ;;  %v400_v13 = vperm.slane %v398_v10, 0  ;;  %v401_v40 = vperm.slane %v398_v10, 1 }
  0x97   : > { %1038 = vmatpush.bf16.msra.mxu1 %v1545_v42  ;;  %v1558_v42 = vld [vmem:[#allocation6 + $0x218] sm:$0xf0] }
  0x98   : > { %1025 = vmatpush.bf16.msra.mxu0 %v1473_v46  ;;  %1018 = vmatmul.bf16.vlgmr.msra.gmra.mxu2 %v2195_v5  ;;  %v1574_v5 = vld [vmem:[#allocation6 + $0x238] sm:$0xf0]  ;;  %v1737_v46 = vld [vmem:[#allocation6 + $0x194] sm:$0xf]  ;;  %v1561_v52 = vor.u32 %v1753_v41, %v1558_v42 }
  0x99   : > { %1066 = vmatpush.bf16.msrb.mxu2 %v1673_v43  ;;  %v1577_v25 = vor.u32 %v1757_v18, %v1574_v5  ;;  %v1505_v43 = vor.u32 %v1739_v32, %v1502_v34 }
  0x9a   : > { %1053 = vmatpush.bf16.msra.mxu3 %v1601_v51  ;;  %v1622_v51 = vld [vmem:[#allocation6 + $0x298] sm:$0xf0] }
  0x9b   : > { %1039 = vmatpush.bf16.msra.mxu1 %v1537_v57  ;;  %v1550_v57 = vld [vmem:[#allocation6 + $0x208] sm:$0xf0]  ;;  %v1625_v62 = vor.u32 %v1769_v50, %v1622_v51 }
  0x9c   : > { %1026 = vmatpush.bf16.msra.mxu0 %v1465_v60  ;;  %v1497_v60 = vor.u32 %v1737_v46, %v1494_v48  ;;  %v1553_v3 = vor.u32 %v1751_v56, %v1550_v57 }
  0x9d   : > { %1067 = vmatpush.bf16.msrb.mxu2 %v1665_v58  ;;  %v1783_v58 = vld [vmem:[#allocation6 + $0x304] sm:$0xf] }
  0x9e   : > { %1054 = vmatpush.bf16.msra.mxu3 %v1593_v2  ;;  %v1486_v2 = vld [vmem:[#allocation6 + $0x188] sm:$0xf0]  ;;  %v1681_v7 = vor.u32 %v1783_v58, %v1678_v59 }
  0x9f   : > { %1040 = vmatpush.bf16.msra.mxu1 %v1529_v8  ;;  %v1489_v8 = vor.u32 %v1735_v1, %v1486_v2 }
  0xa0   : > { %1027 = vmatpush.bf16.msra.mxu0 %v1457_v11 }
  0xa1   : > { %1068 = vmatpush.bf16.msrb.mxu2 %v1657_v9  ;;  %v1617_v9 = vor.u32 %v1767_v4, %v1614_v6 }
  0xa2   : > { %1055 = vmatpush.bf16.msra.mxu3 %v1585_v15 }
  0xa3   : > { %1041 = vmatpush.bf16.msra.mxu1 %v1521_v19 }
  0xa4   : > { %1028 = vmatpush.bf16.msra.mxu0 %v1449_v21 }
  0xa5   : > { %1069 = vmatpush.bf16.msrb.mxu2 %v1649_v61 }
  0xa6   : > { %1056 = vmatpush.bf16.msra.mxu3 %v1577_v25 }
  0xa7   : > { %1042 = vmatpush.bf16.msra.mxu1 %v1513_v30 }
  0xa8   : > { %1029 = vmatpush.bf16.msra.mxu0 %v1441_v33 }
  0xa9   : > { %1070 = vmatpush.bf16.msrb.mxu2 %v1641_v31 }
  0xaa   : > { %1057 = vmatpush.bf16.msra.mxu3 %v1569_v37 }
  0xab   : > { %1043 = vmatpush.bf16.msra.mxu1 %v1505_v43 }
  0xac   : > { %1030 = vmatpush.bf16.msra.mxu0 %v1433_v47 }
  0xad   : > { %1071 = vmatpush.bf16.msrb.mxu2 %v1633_v44 }
  0xae   : > { %1058 = vmatpush.bf16.msra.mxu3 %v1561_v52 }
  0xaf   : > { %1044 = vmatpush.bf16.msra.mxu1 %v1497_v60 }
  0xb0   : > { %1031 = vmatpush.bf16.msra.mxu0 %v1425_v63 }
  0xb1   : > { %1072 = vmatpush.bf16.msrb.mxu2 %v1625_v62 }
  0xb2   : > { %1059 = vmatpush.bf16.msra.mxu3 %v1553_v3 }
  0xb3   : > { %1045 = vmatpush.bf16.msra.mxu1 %v1489_v8  ;;  %1032 = vmatmul.bf16.vlgmr.msra.gmra.mxu0 %v2187_v55 }
  0xb4   : > { %1087 = vmatpush.bf16.msrb.mxu0 %v1681_v7 }
  0xb5   : > { %1060 = vmatmul.bf16.vlgmr.msra.gmra.mxu3 %v2211_v38  ;;  %1073 = vmatpush.bf16.msrb.mxu2 %v1617_v9 }
  0xb6   : > { %1046 = vmatmul.bf16.vlgmr.msra.gmra.mxu1 %v2193_v0 }
  0xb8   : > { %1074 = vmatmul.bf16.vlgmr.msrb.gmra.mxu2 %v2213_v45 }
  0xc3   : > { %1683 = vmatmul.msk.bf16.vlgmr.msrb.gmra.mxu0 %vm894_vm0, %v2203_v49 }
  0xf0   : > { %v907_v11 = vpop.f32.mrf.mxu0 }
  0xf1   : > { %v908_v15 = vadd.f32 %v907_v11, %v400_v13 }
  0xf3   : > { %v921_v14 = vpop.f32.mrf.mxu1 }
  0xf4   : > { %v922_v55 = vadd.f32 %v921_v14, %v908_v15  ;;  %v1115_v15 = vld [vmem:[#allocation2] sm:$0x1] }
  0xf7   : > { %v935_v12 = vpop.f32.mrf.mxu2 }
  0xf8   : > { %v909_v16 = vpop.f32.mrf.mxu0  ;;  %v949_v17 = vpop.f32.mrf.mxu3  ;;  %v936_v0 = vadd.f32 %v935_v12, %v922_v55  ;;  %v1114_v12 = vld [vmem:[%s2268_s3] sm:$0x3] }
  0xf9   : > { %v910_v5 = vadd.f32 %v909_v16, %v400_v13  ;;  %v1123_v14 = vperm.slane %v1114_v12, 0  ;;  %v2012_v16 = vmov 0  }
  0xfa   : > { %v950_v45 = vadd.f32 %v949_v17, %v936_v0  ;;  %1844 = vset.pattern.permute.xlu0 %v2012_v16 }
  0xfb   : > { %v923_v18 = vpop.f32.mrf.mxu1  ;;  %1118 = vperm.xlu0 %1844, %v1115_v15  }
  0xfc   : > { %v924_v19 = vadd.f32 %v923_v18, %v910_v5 }
  0xff   : > { %v937_v38 = vpop.f32.mrf.mxu2 }
 0x100   : > { %v938_v22 = vadd.f32 %v937_v38, %v924_v19  ;;  %v951_v24 = vpop.f32.mrf.mxu3 }
 0x102   : > { %v952_v26 = vadd.f32 %v951_v24, %v938_v22  ;;  %v1124_v22 = vperm.slane %v1114_v12, 1 }
 0x107   : > { %v991_v49 = vpop.f32.mrf.mxu2 }
 0x10f   : > { %v993_v31 = vpop.f32.mrf.mxu2 }
 0x110   : > { %v963_v61 = vpop.f32.mrf.mxu0 }
 0x111   : > { %v964_v20 = vadd.f32 %v963_v61, %v950_v45 }
 0x113   : > { %v977_v21 = vpop.f32.mrf.mxu1 }
 0x114   : > { %v978_v23 = vadd.f32 %v977_v21, %v964_v20 }
 0x116   : > { %v992_v25 = vadd.f32 %v991_v49, %v978_v23 }
 0x118   : > { %v965_v27 = vpop.f32.mrf.mxu0  ;;  %v1094_v29 = vsub.f32 0.0, %v992_v25  ;;  %v1005_v37 = vpop.f32.mrf.mxu3 }
 0x119   : > { %v966_v28 = vadd.f32 %v965_v27, %v952_v26  ;;  %v1006_v44 = vadd.f32 %v1005_v37, %v401_v40 }
 0x11a   : > { %v1098_v34 = vmul.f32 1.442695, %v1094_v29 }
 0x11b   : > { %v979_v30 = vpop.f32.mrf.mxu1  ;;  %v1019_v39 = vpop.f32.mrf.mxu2 }
 0x11c   : > { %v980_v32 = vadd.f32 %v979_v30, %v966_v28  ;;  %1845 = vpow2.f32 %v1098_v34  ;;  %v1020_v50 = vadd.f32 %v1019_v39, %v1006_v44 }
 0x11e   : > { %v994_v33 = vadd.f32 %v993_v31, %v980_v32 }
 0x120   : > { %v1096_v35 = vsub.f32 0.0, %v994_v33  ;;  %v1007_v47 = vpop.f32.mrf.mxu3 }
 0x121   : > { %v1008_v56 = vadd.f32 %v1007_v47, %v401_v40 }
 0x122   : > { %v1102_v36 = vmul.f32 1.442695, %v1096_v35  ;;  %v1846_v41 = vpop.eup %1845 }
 0x123   : > { %v1106_v46 = vadd.f32 1.0, %v1846_v41  ;;  %v1021_v51 = vpop.f32.mrf.mxu2 }
 0x124   : > { %1847 = vpow2.f32 %v1102_v36  ;;  %v1022_v63 = vadd.f32 %v1021_v51, %v1008_v56 }
 0x12a   : > { %v1848_v42 = vpop.eup %1847 }
 0x12b   : > { %v1108_v43 = vadd.f32 1.0, %v1848_v42 }
 0x12d   : > { %1849 = vrcp.f32 %v1108_v43 }
 0x12e   : > { %1851 = vrcp.f32 %v1106_v46 }
 0x130   : > { %v1033_v48 = vpop.f32.mrf.mxu0 }
 0x131   : > { %v1034_v54 = vadd.f32 %v1033_v48, %v1020_v50 }
 0x133   : > { %v1047_v52 = vpop.f32.mrf.mxu1  ;;  %v1850_v53 = vpop.eup %1849 }
 0x134   : > { %1141 = vmatpush.xpose.msrb.mxu1 %v1850_v53  ;;  %v1852_v59 = vpop.eup %1851  ;;  %v1048_v60 = vadd.f32 %v1047_v52, %v1034_v54 }
 0x138   : > { %v1061_v57 = vpop.f32.mrf.mxu3  ;;  %v1035_v58 = vpop.f32.mrf.mxu0  ;;  %1142 = vmatpush.xpose.msrb.mxu1 %v1852_v59 }
 0x139   : > { %v1062_v1 = vadd.f32 %v1061_v57, %v1048_v60  ;;  %v1036_v2 = vadd.f32 %v1035_v58, %v1022_v63 }
 0x13b   : > { %v1075_v62 = vpop.f32.mrf.mxu2  ;;  %v1049_v3 = vpop.f32.mrf.mxu1  ;;  %1143 = vmatmul.f32.vlgmr.msrb.gmra.mxu1 %v1123_v14 }
 0x13c   : > { %v1076_v4 = vadd.f32 %v1075_v62, %v1062_v1  ;;  %v1050_v8 = vadd.f32 %v1049_v3, %v1036_v2 }
 0x140   : > { %v1063_v6 = vpop.f32.mrf.mxu3  ;;  %v1089_v7 = vpop.f32.mrf.mxu0 }
 0x141   : > { %v1090_v9 = vadd.f32 %v1089_v7, %v1076_v4  ;;  %v1064_v10 = vadd.f32 %v1063_v6, %v1050_v8 }
 0x143   : > { %v1077_v11 = vpop.f32.mrf.mxu2  ;;  %v1095_v13 = vsub.f32 0.0, %v1090_v9 }
 0x144   : > { %v1078_v55 = vadd.f32 %v1077_v11, %v1064_v10 }
 0x145   : > { %v1100_v18 = vmul.f32 1.442695, %v1095_v13 }
 0x147   : > { %1853 = vpow2.f32 %v1100_v18 }
 0x148   : > { %v1091_v38 = vpop.f32.mrf.mxu0 }
 0x149   : > { %v1092_v17 = vadd.f32 %v1091_v38, %v1078_v55 }
 0x14b   : > { %v1097_v0 = vsub.f32 0.0, %v1092_v17 }
 0x14d   : > { %v1104_v5 = vmul.f32 1.442695, %v1097_v0  ;;  %v1854_v45 = vpop.eup %1853 }
 0x14e   : > { %v1107_v49 = vadd.f32 1.0, %v1854_v45 }
 0x14f   : > { %1855 = vpow2.f32 %v1104_v5 }
 0x155   : > { %v1856_v19 = vpop.eup %1855 }
 0x156   : > { %v1109_v61 = vadd.f32 1.0, %v1856_v19 }
 0x158   : > { %1857 = vrcp.f32 %v1109_v61 }
 0x159   : > { %1859 = vrcp.f32 %v1107_v49 }
 0x15e   : > { %v1858_v20 = vpop.eup %1857 }
 0x15f   : > { %1161 = vmatpush.xpose.msrb.mxu3 %v1858_v20  ;;  %v1860_v21 = vpop.eup %1859 }
 0x163   : > { %1162 = vmatpush.xpose.msrb.mxu3 %v1860_v21 }
 0x166   : > { %1163 = vmatmul.f32.vlgmr.msrb.gmra.mxu3 %v1124_v22 }
 0x16d   : > { %v1119_v23 = vpop.permute.xlu0 %1118 }
 0x16e   : > { %v1121_v24 = vperm.slane %v1119_v23, 0 }
 0x1b8   : > { %v1144_v25 = vpop.f32.mrf.mxu1 }
 0x1b9   : > { %v1145_v26 = vadd.f32 %v1144_v25, %v1121_v24 }
 0x1e9   : > { %v1164_v27 = vpop.f32.mrf.mxu3 }
 0x1ea   : > { %v1165_v28 = vadd.f32 %v1164_v27, %v1145_v26 }
 0x1ec   : > { %v1684_v29 = vmul.f32 -1.442695, %v1165_v28 }
 0x1ee   : > { %1861 = vpow2.f32 %v1684_v29 }
 0x1f4   : > { %v1862_v30 = vpop.eup %1861 }
 0x1f5   : > { %v1170_v31 = vadd.f32 1.0, %v1862_v30 }
 0x1f7   : > { %1863 = vrcp.f32 %v1170_v31  ;;  %v1182_v35 = vand.u32 2147483648, %v1170_v31  ;;  %v1180_v37 = vand.u32 2147483647, %v1170_v31  ;;  %vm1176_vm2 = vweird.f32 %v1170_v31 }
 0x1f9   : > { %v1183_v40 = vor.u32 1.1754944e-38, %v1182_v35  ;;  %vm1181_vm5 = vcmp.eq.f32.partialorder %v1180_v37, 8.507059e+37 }
 0x1fd   : > { %v1864_v32 = vpop.eup %1863 }
 0x1fe   : > { %v1172_v33 = vmul.f32 %v1864_v32, %v1170_v31  ;;  %vm1177_vm1 = vweird.f32 %v1864_v32 }
 0x1ff   : > { %vm1178_vm3 = vmor %vm1176_vm2, %vm1177_vm1 }
 0x200   : > { %v1173_v34 = vsub.f32 1.0, %v1172_v33 }
 0x202   : > { %v1174_v36 = vmul.f32 %v1864_v32, %v1173_v34 }
 0x204   : > { %v1175_v39 = vadd.f32 %v1864_v32, %v1174_v36 }
 0x206   : > { %v1179_v41 = vsel %vm1178_vm3, %v1864_v32, %v1175_v39 }
 0x207   : > { %v1184_v42 = vsel %vm1181_vm5, %v1183_v40, %v1179_v41 }
 0x208   : > { %1187 = vst.msk [vmem:[%s271_s24] sm:$0x1] %vm1186_vm4, %v1184_v42 }
 0x209   : > { %1961 = shalt.err (!%p1958_p0)
}
 0x20a   : > { %1793 = dma.vmem_to_hbm [thread:$0]  (%p2098_p11), %s1200_s26, 16, %s1202_s10, %s1189_s4  }
 0x20b PF: > { %s1213_s27 = sand.u32 1, %s1992_s20   ;;  %p2281_p3 = scmp.ne.s32.totalorder %s2276_s7, 0 }
 0x20c   : > { %p2282_p5 = scmp.ge.s32.totalorder %s2004_s23, 2  ;;  %s1214_s8 = scalar_lea.sflag [#allocation5], %s1213_s27 }
 0x20e   : > { %p1800_p8 = pnand %p2282_p5, %p2281_p3 }
 0x210   : > { %p1801_p9 = pneg %p1800_p8 }
 0x212   : > { %1987 = dma.done.wait (%p1801_p9), %s1214_s8, 16  }
 0x213   : > { %1989 = vsyncadd (%p1801_p9), %s1214_s8, 4294967280  ;;  %p21_p4 = scmp.ge.s32.totalorder %s2071_s25, 4   ;;  %s2283_s20 = smov %s1996_s21 }
 0x214   : > { %s2284_s21 = smov %s2000_s22  ;;  %s2285_s22 = smov %s2083_s28 }
 0x215   : > { %s2286_s23 = smov %s2071_s25  ;;  %23 = sbr.rel (!%p21_p4) target bundleno = 9 (0x9), region = 89 }
 0x21a   :  { %1219 = vsyncpa [#allocation4], 1 }
 0x21b   :  { %1221 = vsyncpa [#allocation4 + $0x1], 1 }
 0x21c   :  { %1222 = vsyncpa [#allocation7], 1 }
 0x21d   :  { %1223 = vsyncpa [#allocation5], 1 }
 0x21e   :  { %1225 = vsyncpa [#allocation5 + $0x1], 1 }

</bundles_post_ra>
